<compile_context>
chip_gen: v5e
topology: v5e:2x2
jax: 0.10.0
libtpu: 0.0.40
codegen_flags: <defaults>
</compile_context>

<pallas_src>
import functools

import jax
import jax.numpy as jnp
from jax.experimental import pallas as pl
from jax.experimental.pallas import tpu as pltpu

LANE = 128
_MIN_GRID_BLOCKS = 4          # keep >=4 grid blocks so v7x's 2 TCs both get work
_T_UNROLL_MAX = 8             # small T: unroll inside the block; larger T: grid-carry
_TILE_TARGET_BYTES = 4 << 20  # ~4 MiB of input per tile (in+out double-buffered < 32 MiB)


def _cdiv(a, b):
    return -(-a // b)


def _round_up(a, b):
    return _cdiv(a, b) * b


def _row_granularity(dtype):
    """Native packed sublane tile: 8 rows (f32), 16 (bf16/f16), 32 (int8/fp8)."""
    itemsize = jnp.dtype(dtype).itemsize
    return 8 * max(1, 4 // itemsize)


@functools.lru_cache(maxsize=None)
def _vmem_limit_bytes():
    limit = 32 << 20  # safe everywhere (v7x has only 64 MiB physical VMEM per TC)
    try:
        cap = getattr(pltpu.get_tpu_info(), "vmem_capacity_bytes", None)
        if cap is not None and cap >= (100 << 20):  # v5e / v6e: 128 MiB physical
            limit = 64 << 20
    except Exception:
        pass
    return limit


def _compiler_params(dim_sem):
    return pltpu.CompilerParams(
        dimension_semantics=dim_sem,
        vmem_limit_bytes=_vmem_limit_bytes(),
    )


# ---------------------------------------------------------------------------
# Kernels
# ---------------------------------------------------------------------------
def _if_temporal_unrolled_kernel(thresh_ref, x_ref, o_ref):
    """SNN mode, small T (unrolled): mem += x[t]; spike=(mem>=thre)*thre; soft reset."""
    thre = thresh_ref[0]
    thre_o = thre.astype(o_ref.dtype)               # scalar cast, not a vector cast
    zero_o = jnp.zeros((), o_ref.dtype)
    T = x_ref.shape[0]                               # compile-time constant
    mem = jnp.full(x_ref.shape[1:], 0.5 * thre, dtype=jnp.float32)
    for t in range(T):                               # static unroll (small T)
        mem = mem + x_ref[t].astype(jnp.float32)
        fire = mem >= thre
        o_ref[t] = jnp.where(fire, thre_o, zero_o)   # spike emitted in output dtype
        mem = jnp.where(fire, mem - thre, mem)       # reset-by-subtraction (f32)


def _if_temporal_grid_kernel(thresh_ref, x_ref, o_ref, mem_ref):
    """SNN mode, large T: T is a trailing 'arbitrary' grid axis; mem lives in VMEM."""
    thre = thresh_ref[0]

    @pl.when(pl.program_id(1) == 0)
    def _():
        mem_ref[...] = jnp.full(mem_ref.shape, 0.5 * thre, dtype=jnp.float32)

    mem = mem_ref[...] + x_ref[0].astype(jnp.float32)
    fire = mem >= thre
    o_ref[0] = jnp.where(fire, thre.astype(o_ref.dtype), jnp.zeros((), o_ref.dtype))
    mem_ref[...] = jnp.where(fire, mem - thre, mem)


def _if_qcfs_kernel(thresh_ref, x_ref, o_ref, *, L):
    """ANN/QCFS mode: clamp(x/thre,0,1) -> floor(.*L+0.5)/L -> *thre, scalars folded."""
    thre = thresh_ref[0]
    scale_in = L / thre                      # scalar ops; vector path is 2 vmuls total
    scale_out = thre * (1.0 / L)
    y = jnp.clip(x_ref[...].astype(jnp.float32) * scale_in, 0.0, L)
    y = jnp.floor(y + 0.5)
    o_ref[...] = (y * scale_out).astype(o_ref.dtype)


# ---------------------------------------------------------------------------
# Wrapper
# ---------------------------------------------------------------------------
def _choose_block_rows(R, bytes_per_row, gran):
    if R <= gran:
        return int(R)  # block row dim == full array dim -> exempt from /8 rule
    target = max(1, _TILE_TARGET_BYTES // max(bytes_per_row, 1))
    cap = _round_up(_cdiv(R, _MIN_GRID_BLOCKS), gran)   # guarantee a multi-block grid
    br = max(gran, (target // gran) * gran)
    return int(max(gran, min(br, cap)))


def if_forward(x, thresh, *, T=0, L=8):
    """Forward pass of the PyTorch `IF` module.

    x:      (T*B, C, H, W) when T > 0, else (B, C, H, W); dtype preserved end-to-end.
    thresh: scalar (the nn.Parameter of shape [1])
    """
    x = jnp.asarray(x)
    if not jnp.issubdtype(x.dtype, jnp.floating):
        x = x.astype(jnp.float32)
    out_dtype = x.dtype
    elem_bytes = jnp.dtype(out_dtype).itemsize
    gran = _row_granularity(out_dtype)
    thresh = jnp.asarray(thresh, jnp.float32).reshape((1,))
    thresh_spec = pl.BlockSpec(memory_space=pltpu.MemorySpace.SMEM)

    if T > 0:
        TB = x.shape[0]
        assert TB % T == 0, "leading dim must be divisible by T"
        rest = x.shape[1:]
        flat = x.reshape(T, -1)                       # free metadata reshape
        M = flat.shape[1]
        pad = (-M) % LANE                             # only lane-dim divisibility needed
        if pad:
            # TODO(synk): rare ragged tail (M % 128 != 0) still costs one pad + one slice pass.
            flat = jnp.pad(flat, ((0, 0), (0, pad)))
        R = flat.shape[1] // LANE
        x3 = flat.reshape(T, R, LANE)

        if T <= _T_UNROLL_MAX:
            block_rows = _choose_block_rows(R, T * LANE * elem_bytes, gran)
            grid = (_cdiv(R, block_rows),)            # partial last block handled by Pallas
            out = pl.pallas_call(
                _if_temporal_unrolled_kernel,
                out_shape=jax.ShapeDtypeStruct((T, R, LANE), out_dtype),
                grid_spec=pltpu.PrefetchScalarGridSpec(
                    num_scalar_prefetch=0,
                    grid=grid,
                    in_specs=[
                        thresh_spec,
                        pl.BlockSpec((T, block_rows, LANE), lambda i: (0, i, 0)),
                    ],
                    out_specs=pl.BlockSpec((T, block_rows, LANE), lambda i: (0, i, 0)),
                ),
                compiler_params=_compiler_params(("parallel",)),
            )(thresh, x3)
        else:
            # Membrane potential carried in VMEM scratch across the trailing T axis.
            block_rows = _choose_block_rows(R, LANE * elem_bytes, gran)
            grid = (_cdiv(R, block_rows), T)
            out = pl.pallas_call(
                _if_temporal_grid_kernel,
                out_shape=jax.ShapeDtypeStruct((T, R, LANE), out_dtype),
                grid_spec=pltpu.PrefetchScalarGridSpec(
                    num_scalar_prefetch=0,
                    grid=grid,
                    in_specs=[
                        thresh_spec,
                        pl.BlockSpec((1, block_rows, LANE), lambda i, t: (t, i, 0)),
                    ],
                    out_specs=pl.BlockSpec((1, block_rows, LANE), lambda i, t: (t, i, 0)),
                    scratch_shapes=[pltpu.VMEM((block_rows, LANE), jnp.float32)],
                ),
                compiler_params=_compiler_params(("parallel", "arbitrary")),
            )(thresh, x3)

        if pad:
            out = out.reshape(T, R * LANE)[:, :M]
        return out.reshape((TB,) + rest)

    else:
        shape = x.shape
        flat = x.reshape(-1)
        M = flat.shape[0]
        pad = (-M) % LANE
        if pad:
            # TODO(synk): rare ragged tail (M % 128 != 0) still costs one pad + one slice pass.
            flat = jnp.pad(flat, (0, pad))
        R = flat.shape[0] // LANE
        x2 = flat.reshape(R, LANE)

        block_rows = _choose_block_rows(R, LANE * elem_bytes, gran)
        grid = (_cdiv(R, block_rows),)
        out = pl.pallas_call(
            functools.partial(_if_qcfs_kernel, L=float(L)),
            out_shape=jax.ShapeDtypeStruct((R, LANE), out_dtype),
            grid_spec=pltpu.PrefetchScalarGridSpec(
                num_scalar_prefetch=0,
                grid=grid,
                in_specs=[
                    thresh_spec,
                    pl.BlockSpec((block_rows, LANE), lambda i: (i, 0)),
                ],
                out_specs=pl.BlockSpec((block_rows, LANE), lambda i: (i, 0)),
            ),
            compiler_params=_compiler_params(("parallel",)),
        )(thresh, x2)

        if pad:
            return out.reshape(-1)[:M].reshape(shape)
        return out.reshape(shape)


# ---------------------------------------------------------------------------
# Pure-JAX references (mirror the PyTorch forward exactly)
# ---------------------------------------------------------------------------
def _ref_temporal(x, thresh, T):
    TB = x.shape[0]
    B = TB // T
    xs = x.reshape((T, B) + x.shape[1:])
    mem = 0.5 * thresh
    outs = []
    for t in range(T):
        mem = mem + xs[t]
        spike_bin = (mem >= thresh).astype(x.dtype)
        spike = spike_bin * thresh
        mem = mem - spike_bin * thresh
        outs.append(spike)
    return jnp.stack(outs, 0).reshape(x.shape)


def _ref_qcfs(x, thresh, L):
    y = jnp.clip(x / thresh, 0.0, 1.0)
    y = jnp.floor(y * L + 0.5) / L
    return y * thresh


# ---------------------------------------------------------------------------
if __name__ == "__main__":
    key = jax.random.PRNGKey(0)
    B, C, H, W = 2, 4, 16, 16
    L = 8
    thresh = jnp.array(8.0, jnp.float32)  # nn.Parameter([8.0]) — deterministic init
    k1, k2, k3 = jax.random.split(key, 3)

    # SNN mode, small T (unrolled kernel)
    T = 4
    x_snn = 8.0 * jax.random.normal(k1, (T * B, C, H, W), dtype=jnp.float32)
    y_snn = jax.block_until_ready(if_forward(x_snn, thresh, T=T, L=L))
    ref_snn = _ref_temporal(x_snn, float(thresh), T)
    assert y_snn.shape == x_snn.shape and y_snn.dtype == x_snn.dtype
    assert jnp.allclose(y_snn, ref_snn, atol=1e-5), "temporal (unrolled) mismatch"

    # SNN mode, larger T (membrane carried across the grid's trailing axis)
    T_big = 16
    x_big = 8.0 * jax.random.normal(k2, (T_big * B, C, H, W), dtype=jnp.float32)
    y_big = jax.block_until_ready(if_forward(x_big, thresh, T=T_big, L=L))
    ref_big = _ref_temporal(x_big, float(thresh), T_big)
    assert y_big.shape == x_big.shape and y_big.dtype == x_big.dtype
    assert jnp.allclose(y_big, ref_big, atol=1e-5), "temporal (grid-carried) mismatch"

    # ANN / QCFS mode (T == 0)
    x_ann = 8.0 * jax.random.normal(k3, (B, C, H, W), dtype=jnp.float32)
    y_ann = jax.block_until_ready(if_forward(x_ann, thresh, T=0, L=L))
    ref_ann = _ref_qcfs(x_ann, float(thresh), float(L))
    assert y_ann.shape == x_ann.shape and y_ann.dtype == x_ann.dtype
    assert jnp.allclose(y_ann, ref_ann, atol=1e-5), "QCFS path mismatch"

    # bf16 passthrough sanity check (no wrapper-level up-cast / extra HBM pass)
    x_bf16 = x_ann.astype(jnp.bfloat16)
    y_bf16 = jax.block_until_ready(if_forward(x_bf16, thresh, T=0, L=L))
    assert y_bf16.dtype == jnp.bfloat16 and y_bf16.shape == x_bf16.shape

    print("KERNEL_OK")
</pallas_src>

<mosaic_0001>
module attributes {stable_mosaic.version = 11 : i64} {
  func.func @_if_temporal_unrolled_kernel(%arg0: i32, %arg1: memref<1xf32, #tpu.memory_space<smem>>, %arg2: memref<4x8x128xf32, #tpu.memory_space<vmem>>, %arg3: memref<4x8x128xf32, #tpu.memory_space<vmem>>) attributes {dimension_semantics = [#tpu.dimension_semantics<parallel>], iteration_bounds = array<i64: 2>, scalar_prefetch = 0 : i64, scratch_operands = 0 : i64, tpu.core_type = #tpu.core_type<tc>, window_params = [{transform_indices = @transform_0, window_bounds = array<i64: 1>}, {transform_indices = @transform_1, window_bounds = array<i64: 4, 8, 128>}, {transform_indices = @transform_2, window_bounds = array<i64: 4, 8, 128>}]} {
    %c0 = arith.constant 0 : index
    %0 = memref.load %arg1[%c0] : memref<1xf32, #tpu.memory_space<smem>>
    %cst = arith.constant 5.000000e-01 : f32
    %1 = arith.mulf %cst, %0 : f32
    %2 = vector.broadcast %1 : f32 to vector<8x128xf32>
    %c0_0 = arith.constant 0 : index
    %c0_1 = arith.constant 0 : index
    %c0_2 = arith.constant 0 : index
    %3 = vector.load %arg2[%c0_0, %c0_1, %c0_2] : memref<4x8x128xf32, #tpu.memory_space<vmem>>, vector<1x8x128xf32>
    %4 = vector.shape_cast %3 : vector<1x8x128xf32> to vector<8x128xf32>
    %5 = arith.addf %2, %4 : vector<8x128xf32>
    %6 = vector.broadcast %0 : f32 to vector<8x128xf32>
    %7 = arith.cmpf oge, %5, %6 : vector<8x128xf32>
    %cst_3 = arith.constant 0.000000e+00 : f32
    %8 = vector.broadcast %0 : f32 to vector<8x128xf32>
    %9 = vector.broadcast %cst_3 : f32 to vector<8x128xf32>
    %10 = arith.select %7, %8, %9 : vector<8x128xi1>, vector<8x128xf32>
    %c0_4 = arith.constant 0 : index
    %c0_5 = arith.constant 0 : index
    %c0_6 = arith.constant 0 : index
    %11 = vector.load %arg3[%c0_4, %c0_5, %c0_6] : memref<4x8x128xf32, #tpu.memory_space<vmem>>, vector<1x8x128xf32>
    %12 = vector.shape_cast %11 : vector<1x8x128xf32> to vector<8x128xf32>
    %13 = vector.shape_cast %10 : vector<8x128xf32> to vector<1x8x128xf32>
    tpu.vector_store %arg3[%c0_4, %c0_5, %c0_6], %13 {strides = array<i32>} : memref<4x8x128xf32, #tpu.memory_space<vmem>>, vector<1x8x128xf32>,
    %14 = vector.broadcast %0 : f32 to vector<8x128xf32>
    %15 = arith.subf %5, %14 : vector<8x128xf32>
    %16 = arith.select %7, %15, %5 : vector<8x128xi1>, vector<8x128xf32>
    %c1 = arith.constant 1 : index
    %c0_7 = arith.constant 0 : index
    %c0_8 = arith.constant 0 : index
    %17 = vector.load %arg2[%c1, %c0_7, %c0_8] : memref<4x8x128xf32, #tpu.memory_space<vmem>>, vector<1x8x128xf32>
    %18 = vector.shape_cast %17 : vector<1x8x128xf32> to vector<8x128xf32>
    %19 = arith.addf %16, %18 : vector<8x128xf32>
    %20 = vector.broadcast %0 : f32 to vector<8x128xf32>
    %21 = arith.cmpf oge, %19, %20 : vector<8x128xf32>
    %cst_9 = arith.constant 0.000000e+00 : f32
    %22 = vector.broadcast %0 : f32 to vector<8x128xf32>
    %23 = vector.broadcast %cst_9 : f32 to vector<8x128xf32>
    %24 = arith.select %21, %22, %23 : vector<8x128xi1>, vector<8x128xf32>
    %c1_10 = arith.constant 1 : index
    %c0_11 = arith.constant 0 : index
    %c0_12 = arith.constant 0 : index
    %25 = vector.load %arg3[%c1_10, %c0_11, %c0_12] : memref<4x8x128xf32, #tpu.memory_space<vmem>>, vector<1x8x128xf32>
    %26 = vector.shape_cast %25 : vector<1x8x128xf32> to vector<8x128xf32>
    %27 = vector.shape_cast %24 : vector<8x128xf32> to vector<1x8x128xf32>
    tpu.vector_store %arg3[%c1_10, %c0_11, %c0_12], %27 {strides = array<i32>} : memref<4x8x128xf32, #tpu.memory_space<vmem>>, vector<1x8x128xf32>,
    %28 = vector.broadcast %0 : f32 to vector<8x128xf32>
    %29 = arith.subf %19, %28 : vector<8x128xf32>
    %30 = arith.select %21, %29, %19 : vector<8x128xi1>, vector<8x128xf32>
    %c2 = arith.constant 2 : index
    %c0_13 = arith.constant 0 : index
    %c0_14 = arith.constant 0 : index
    %31 = vector.load %arg2[%c2, %c0_13, %c0_14] : memref<4x8x128xf32, #tpu.memory_space<vmem>>, vector<1x8x128xf32>
    %32 = vector.shape_cast %31 : vector<1x8x128xf32> to vector<8x128xf32>
    %33 = arith.addf %30, %32 : vector<8x128xf32>
    %34 = vector.broadcast %0 : f32 to vector<8x128xf32>
    %35 = arith.cmpf oge, %33, %34 : vector<8x128xf32>
    %cst_15 = arith.constant 0.000000e+00 : f32
    %36 = vector.broadcast %0 : f32 to vector<8x128xf32>
    %37 = vector.broadcast %cst_15 : f32 to vector<8x128xf32>
    %38 = arith.select %35, %36, %37 : vector<8x128xi1>, vector<8x128xf32>
    %c2_16 = arith.constant 2 : index
    %c0_17 = arith.constant 0 : index
    %c0_18 = arith.constant 0 : index
    %39 = vector.load %arg3[%c2_16, %c0_17, %c0_18] : memref<4x8x128xf32, #tpu.memory_space<vmem>>, vector<1x8x128xf32>
    %40 = vector.shape_cast %39 : vector<1x8x128xf32> to vector<8x128xf32>
    %41 = vector.shape_cast %38 : vector<8x128xf32> to vector<1x8x128xf32>
    tpu.vector_store %arg3[%c2_16, %c0_17, %c0_18], %41 {strides = array<i32>} : memref<4x8x128xf32, #tpu.memory_space<vmem>>, vector<1x8x128xf32>,
    %42 = vector.broadcast %0 : f32 to vector<8x128xf32>
    %43 = arith.subf %33, %42 : vector<8x128xf32>
    %44 = arith.select %35, %43, %33 : vector<8x128xi1>, vector<8x128xf32>
    %c3 = arith.constant 3 : index
    %c0_19 = arith.constant 0 : index
    %c0_20 = arith.constant 0 : index
    %45 = vector.load %arg2[%c3, %c0_19, %c0_20] : memref<4x8x128xf32, #tpu.memory_space<vmem>>, vector<1x8x128xf32>
    %46 = vector.shape_cast %45 : vector<1x8x128xf32> to vector<8x128xf32>
    %47 = arith.addf %44, %46 : vector<8x128xf32>
    %48 = vector.broadcast %0 : f32 to vector<8x128xf32>
    %49 = arith.cmpf oge, %47, %48 : vector<8x128xf32>
    %cst_21 = arith.constant 0.000000e+00 : f32
    %50 = vector.broadcast %0 : f32 to vector<8x128xf32>
    %51 = vector.broadcast %cst_21 : f32 to vector<8x128xf32>
    %52 = arith.select %49, %50, %51 : vector<8x128xi1>, vector<8x128xf32>
    %c3_22 = arith.constant 3 : index
    %c0_23 = arith.constant 0 : index
    %c0_24 = arith.constant 0 : index
    %53 = vector.load %arg3[%c3_22, %c0_23, %c0_24] : memref<4x8x128xf32, #tpu.memory_space<vmem>>, vector<1x8x128xf32>
    %54 = vector.shape_cast %53 : vector<1x8x128xf32> to vector<8x128xf32>
    %55 = vector.shape_cast %52 : vector<8x128xf32> to vector<1x8x128xf32>
    tpu.vector_store %arg3[%c3_22, %c0_23, %c0_24], %55 {strides = array<i32>} : memref<4x8x128xf32, #tpu.memory_space<vmem>>, vector<1x8x128xf32>,
    return
  }
  func.func @transform_0(%arg0: i32) -> i32 {
    %c0_i32 = arith.constant 0 : i32
    %c0_i32_0 = arith.constant 0 : i32
    return %c0_i32 : i32
  }
  func.func @transform_1(%arg0: i32) -> (i32, i32, i32) {
    %c0_i32 = arith.constant 0 : i32
    %c0_i32_0 = arith.constant 0 : i32
    %c0_i32_1 = arith.constant 0 : i32
    return %c0_i32, %arg0, %c0_i32_0 : i32, i32, i32
  }
  func.func @transform_2(%arg0: i32) -> (i32, i32, i32) {
    %c0_i32 = arith.constant 0 : i32
    %c0_i32_0 = arith.constant 0 : i32
    %c0_i32_1 = arith.constant 0 : i32
    return %c0_i32, %arg0, %c0_i32_0 : i32, i32, i32
  }
}

</mosaic_0001>

<bundles_post_ra>
// kernel: tpu_custom_call.1
= control target key start
LH: loop header
LB: loop body
LE: loop exit
PB: predicated region body
PF: predicated region fallthrough
CT: control target
= control target key end

     0   :  { %s605_s0 = inlined_call_operand.<no memory space> [shape: f32[1], index: 0, kind: input, shape index: {}]   ;;  %s606_s1 = inlined_call_operand.hbm [shape: f32[4,16,128], index: 1, kind: input, shape index: {}]   ;;  %s607_s2 = inlined_call_operand.hbm [shape: f32[4,16,128], index: 2, kind: output, shape index: {}]  }
   0x1   :  { %7 = sst [smem:[#allocation2]] %s605_s0 }
   0x2   :  { %8 = vsyncpa [#allocation4], 0 }
   0x3   :  { %10 = vsyncpa [#allocation4 + $0x1], 0 }
   0x4   :  { %11 = vsyncpa [#allocation5], 0 }
   0x5   :  { %13 = vsyncpa [#allocation5 + $0x1], 0  ;;  %s480_s11 = smov 0   ;;  %s482_s12 = smov 0  }
   0x6   :  { %s484_s13 = smov 0   ;;  %s486_s14 = smov 0  }
   0x7 LB: > { %s501_s0 = sadd.s32 4294967295, %s454_s14   ;;  %s288_s15 = sadd.s32 4294967294, %s454_s14   ;;  %s454_s14 = sphi %s486_s14, %s616_s14   ;;  %s450_s13 = sphi %s484_s13, %s615_s13   ;;  %s446_s12 = sphi %s482_s12, %s614_s12   ;;  %s442_s11 = sphi %s480_s11, %s613_s11  }
   0x8   : > { %s505_s16 = sadd.s32 1, %s454_s14   ;;  %s47_s17 = sadd.s32 1, %s450_s13 }
   0x9   : > { %s44_s18 = ssub.s32 %s454_s14, %s505_s16  ;;  %p54_p0 = scmp.ne.s32.totalorder %s450_s13, %s446_s12 }
   0xa   : > { %p45_p1 = scmp.eq.s32.totalorder %s44_s18, 0  ;;  %p55_p2 = scmp.eq.s32.totalorder %s454_s14, 0 }
   0xb   : > { %p60_p3 = scmp.ne.s32.totalorder %s446_s12, %s442_s11  ;;  %p61_p4 = scmp.eq.s32.totalorder %s501_s0, 0 }
   0xc   : > { %s517_s19 = scalar_select %p45_p1, %s450_s13, %s47_s17  }
   0xd   : > { %p519_p5 = por %p55_p2, %p54_p0  ;;  %p523_p6 = por %p61_p4, %p60_p3 }
   0xe   : > { %p84_p7 = scmp.eq.s32.totalorder %s501_s0, 1  ;;  %p90_p8 = scmp.eq.s32.totalorder %s288_s15, 1 }
   0xf   : > { %p290_p9 = scmp.ge.s32.totalorder %s454_s14, 2  ;;  %p318_p10 = scmp.lt.s32.totalorder %s454_s14, 2 }
  0x10   : > { %p530_p11 = por %p84_p7, %p54_p0  ;;  %p534_p12 = por %p90_p8, %p60_p3 }
  0x11   : > { %s113_s24 = sand.u32 1, %s450_s13   ;;  %s292_s25 = sshll.u32 %s454_s14, 3 }
  0x12   : > { %s291_s26 = sshll.u32 %s113_s24, 5  ;;  %s121_s29 = scalar_lea.hbm %s606_s1, %s292_s25 }
  0x13   : > { %s122_s30 = sshll.u32 %s121_s29, 4  ;;  %s117_s3 = scalar_lea.vmem [#allocation3], %s291_s26  ;;  %s123_s30 = int_to_ptr.hbm [resolvable:$true] %s122_s30 }
  0x14   : > { %s124_s4 = sshll.u32 %s117_s3, 4  ;;  %p545_p13 = pnand %p318_p10, %p519_p5  ;;  %s125_s4 = int_to_ptr.vmem [resolvable:$true] %s124_s4 }
  0x15   : > { %p293_p0 = scmp.ge.s32.totalorder %s454_s14, 1  ;;  %s114_s6 = scalar_lea.sflag [#allocation4], %s113_s24 }
  0x16   : > { %s358_s7 = sshra.s32 %s123_s30, 4  ;;  %p362_p2 = pneg %p545_p13  ;;  %s359_s7 = int_to_ptr.hbm [resolvable:$true] %s358_s7 }
  0x17   : > { %s360_s8 = scalar_lea.hbm %s359_s7, 32  ;;  %s365_s15 = scalar_lea.hbm %s606_s1, 64 }
  0x18   : > { %p361_p1 = scmp.ne.s32.totalorder %s359_s7, %s360_s8  ;;  %p366_p5 = scmp.lt.s32.totalorder %s359_s7, %s606_s1 }
  0x19   : > { %p367_p7 = scmp.lt.s32.totalorder %s365_s15, %s360_s8 }
  0x1a   : > { %p363_p3 = pnand %p362_p2, %p361_p1 }
  0x1b   : > { %p368_p8 = por %p367_p7, %p366_p5 }
  0x1c   : > { %p364_p4 = pneg %p363_p3 }
  0x1e   : > { %p369_p10 = pnand %p368_p8, %p364_p4 }
  0x20   : > { %372 = shalt.err (!%p369_p10)
}
  0x21   : > { %s456_s20 = smov 256   ;;  %s457_s24 = smov 128  }
  0x22   : > { %s458_s25 = smov 8   ;;  %p132_p1 = scmp.lt.s32.totalorder %s454_s14, 3 }
  0x23   : > { %313 = dma.hbm_to_vmem [thread:$0]  (!%p545_p13), %s123_s30, 512, %s125_s4, %s114_s6, %s456_s20, %s457_s24, %s458_s25  }
  0x24   : > { %p133_p2 = pnand %p293_p0, %p132_p1 }
  0x25   : > { %s564_s26 = sand.u32 (!%p133_p2), 1, %s446_s12  }
  0x26   : > { %136 = sbr.rel (%p133_p2) target bundleno = 77 (0x4d), region = 28  ;;  %s294_s27 = sshll.u32 (!%p133_p2), %s564_s26, 5 }
  0x27   : > { %s139_s28 = scalar_lea.sflag (!%p133_p2), [#allocation4], %s564_s26  ;;  %s142_s29 = scalar_lea.vmem (!%p133_p2), [#allocation3], %s294_s27 }
  0x2b   : > { %433 = dma.done.wait (%p523_p6), %s139_s28, 512  }
  0x2c   : > { %435 = vsyncadd (%p523_p6), %s139_s28, 4294966784  ;;  %s164_s3 = sld [smem:[#allocation2]]  ;;  %v167_v0 = vld [vmem:[%s142_s29] sm:$0xff]  ;;  %v296_v5 = vld [vmem:[%s142_s29 + $0x8] sm:$0xff]  ;;  %s163_s4 = scalar_lea.vmem [#allocation6], %s294_s27 }
  0x2d   : > { %v298_v10 = vld [vmem:[%s142_s29 + $0x10] sm:$0xff]  ;;  %s303_s21 = sshll.u32 %s501_s0, 3  ;;  %s212_s8 = sshll.u32 %s163_s4, 4  ;;  %v300_v15 = vld [vmem:[%s142_s29 + $0x18] sm:$0xff]  ;;  %s213_s8 = int_to_ptr.vmem [resolvable:$true] %s212_s8 }
  0x2e   : > { %s211_s7 = scalar_lea.hbm %s607_s2, %s303_s21  ;;  %s201_s0 = scalar_lea.sflag [#allocation5], %s564_s26 }
  0x2f   : > { %s214_s9 = sshll.u32 %s211_s7, 4  ;;  %s408_s20 = scalar_lea.hbm %s607_s2, 64  ;;  %s215_s9 = int_to_ptr.hbm [resolvable:$true] %s214_s9 }
  0x30   : > { %s402_s10 = sshra.s32 %s215_s9, 4  ;;  %s403_s10 = int_to_ptr.hbm [resolvable:$true] %s402_s10 }
  0x31   : > { %s404_s15 = scalar_lea.hbm %s403_s10, 32  ;;  %p409_p3 = scmp.lt.s32.totalorder %s403_s10, %s607_s2 }
  0x32   : > { %s165_s30 = smul.f32 0.5, %s164_s3  ;;  %v169_v2 = vstv %s164_s3  ;;  %p405_p6 = scmp.ne.s32.totalorder %s403_s10, %s404_s15 }
  0x33   : > { %p410_p4 = scmp.lt.s32.totalorder %s408_s20, %s404_s15 }
  0x34   : > { %v166_v1 = vstv %s165_s30  ;;  %p406_p13 = pnand %p405_p6, %p530_p11 }
  0x35   : > { %v168_v3 = vadd.f32 %v167_v0, %v166_v1  ;;  %p411_p5 = por %p410_p4, %p409_p3 }
  0x36   : > { %p407_p0 = pneg %p406_p13 }
  0x37   : > { %vm170_vm0 = vcmp.ge.f32.partialorder %v168_v3, %v169_v2  ;;  %v173_v4 = vsub.f32 %v168_v3, %v169_v2 }
  0x38   : > { %v171_v6 = vsel %vm170_vm0, %v169_v2, 0.0  ;;  %p412_p7 = pnand %p411_p5, %p407_p0 }
  0x39   : > { %172 = vst [vmem:[%s163_s4] sm:$0xff] %v171_v6  ;;  %v174_v7 = vsel %vm170_vm0, %v173_v4, %v168_v3 }
  0x3a   : > { %v177_v8 = vadd.f32 %v296_v5, %v174_v7 }
  0x3c   : > { %vm178_vm1 = vcmp.ge.f32.partialorder %v177_v8, %v169_v2  ;;  %v182_v9 = vsub.f32 %v177_v8, %v169_v2 }
  0x3d   : > { %v179_v11 = vsel %vm178_vm1, %v169_v2, 0.0 }
  0x3e   : > { %297 = vst [vmem:[%s163_s4 + $0x8] sm:$0xff] %v179_v11  ;;  %v183_v12 = vsel %vm178_vm1, %v182_v9, %v177_v8 }
  0x3f   : > { %v186_v13 = vadd.f32 %v298_v10, %v183_v12 }
  0x41   : > { %vm187_vm2 = vcmp.ge.f32.partialorder %v186_v13, %v169_v2  ;;  %v191_v14 = vsub.f32 %v186_v13, %v169_v2 }
  0x42   : > { %v188_v16 = vsel %vm187_vm2, %v169_v2, 0.0 }
  0x43   : > { %299 = vst [vmem:[%s163_s4 + $0x10] sm:$0xff] %v188_v16  ;;  %v192_v17 = vsel %vm187_vm2, %v191_v14, %v186_v13 }
  0x44   : > { %v195_v18 = vadd.f32 %v300_v15, %v192_v17 }
  0x46   : > { %vm196_vm3 = vcmp.ge.f32.partialorder %v195_v18, %v169_v2 }
  0x47   : > { %v197_v19 = vsel %vm196_vm3, %v169_v2, 0.0 }
  0x48   : > { %301 = vst [vmem:[%s163_s4 + $0x18] sm:$0xff] %v197_v19 }
  0x49   : > { %415 = shalt.err (!%p412_p7)
}
  0x4a   : > { %s459_s26 = smov 128   ;;  %s460_s27 = smov 256  }
  0x4b   : > { %s461_s28 = smov 8  }
  0x4c   : > { %308 = dma.vmem_to_hbm [thread:$0]  (%p530_p11), %s213_s8, 512, %s215_s9, %s201_s0, %s459_s26, %s460_s27, %s461_s28  }
  0x4d PF: > { %s229_s29 = sand.u32 1, %s442_s11   ;;  %p315_p8 = pnand %p290_p9, %p534_p12 }
  0x4e   : > { %s230_s3 = scalar_lea.sflag [#allocation5], %s229_s29 }
  0x4f   : > { %p316_p10 = pneg %p315_p8 }
  0x51   : > { %437 = dma.done.wait (%p316_p10), %s230_s3, 512  }
  0x52   : > { %439 = vsyncadd (%p316_p10), %s230_s3, 4294966784  ;;  %p16_p1 = scmp.ge.s32.totalorder %s505_s16, 4   ;;  %s613_s11 = smov %s446_s12 }
  0x53   : > { %s614_s12 = smov %s450_s13  ;;  %s615_s13 = smov %s517_s19 }
  0x54   : > { %s616_s14 = smov %s505_s16  ;;  %18 = sbr.rel (!%p16_p1) target bundleno = 7 (0x7), region = 79 }
  0x59   :  { %236 = vsyncpa [#allocation4], 1 }
  0x5a   :  { %238 = vsyncpa [#allocation4 + $0x1], 1 }
  0x5b   :  { %239 = vsyncpa [#allocation5], 1 }
  0x5c   :  { %241 = vsyncpa [#allocation5 + $0x1], 1 }

</bundles_post_ra>
